<compile_context>
chip_gen: v7x
topology: tpu7x:2x2x1
jax: 0.10.0
libtpu: 0.0.40
codegen_flags: <defaults>
</compile_context>

<pallas_src>
import functools

import numpy as np

import jax
import jax.numpy as jnp
from jax.experimental import pallas as pl
from jax.experimental.pallas import tpu as pltpu


def _ft_kernel(fs_ref, ft_ref, out_ref, *, p1, p2, batch, tb):
    """One grid step processes TB batch rows; writes one lane-dense partial-sum tile."""
    i = pl.program_id(0)

    # Native-dtype tiles DMA'd by BlockSpec; upcast to f32 only inside the kernel.
    fs = fs_ref[...].astype(jnp.float32)  # (TB, C, N)
    ft = ft_ref[...].astype(jnp.float32)  # (TB, C, N)
    c = fs.shape[1]

    # factor: mean over channel of f ** p1  -> (TB, N)
    if p1 == 2:
        s_pow = fs * fs
        t_pow = ft * ft
    else:
        s_pow = fs ** p1
        t_pow = ft ** p1
    inv_c = jnp.float32(1.0 / c)
    s_fac = jnp.sum(s_pow, axis=1) * inv_c  # (TB, N)
    t_fac = jnp.sum(t_pow, axis=1) * inv_c  # (TB, N)

    # F.normalize(..., p=2, dim=1, eps=1e-12): v / max(||v||_2, eps), per batch row.
    s_norm = jnp.sqrt(jnp.sum(s_fac * s_fac, axis=1, keepdims=True))  # (TB, 1)
    t_norm = jnp.sqrt(jnp.sum(t_fac * t_fac, axis=1, keepdims=True))  # (TB, 1)
    s_n = s_fac / jnp.maximum(s_norm, 1e-12)
    t_n = t_fac / jnp.maximum(t_norm, 1e-12)

    diff = s_n - t_n
    if p2 == 1:
        per_row = jnp.sum(jnp.abs(diff), axis=1, keepdims=True)   # (TB, 1)
    elif p2 == 2:
        per_row = jnp.sum(diff * diff, axis=1, keepdims=True)     # (TB, 1)
    else:
        per_row = jnp.sum(diff ** p2, axis=1, keepdims=True)      # (TB, 1)

    # Mask out padded rows of the last (overhanging) batch tile — only if one exists.
    if batch % tb != 0:
        row_ids = jax.lax.broadcasted_iota(jnp.int32, (tb, 1), 0) + i * tb
        per_row = jnp.where(row_ids < batch, per_row, 0.0)
    partial = jnp.sum(per_row)  # scalar partial sum for this tile

    # Lane-dense unmasked store; host-side glue reads out[:, 0, 0].
    out_ref[...] = jnp.broadcast_to(partial, (1, 8, 128)).astype(jnp.float32)


def _adaptive_avg_pool_nchw(x, out_hw):
    """Plain-JAX glue: adaptive_avg_pool2d to (out_hw, out_hw), matching PyTorch bins."""
    B, C, H, W = x.shape
    if H == out_hw and W == out_hw:
        return x
    if H % out_hw == 0 and W % out_hw == 0:
        kh, kw = H // out_hw, W // out_hw
        return x.reshape(B, C, out_hw, kh, out_hw, kw).mean(axis=(3, 5))

    # General (non-divisible) case: PyTorch bin i covers
    #   [floor(i*In/out), ceil((i+1)*In/out)); express pooling as two small matmuls.
    def pool_mat(in_size):
        m = np.zeros((out_hw, in_size), dtype=np.float32)
        for i in range(out_hw):
            s = (i * in_size) // out_hw
            e = -((-(i + 1) * in_size) // out_hw)  # ceil((i+1)*in/out)
            m[i, s:e] = 1.0 / (e - s)
        return jnp.asarray(m)

    ph = pool_mat(H)  # (out_hw, H)
    pw = pool_mat(W)  # (out_hw, W)
    y = jnp.einsum("oh,bchw,pw->bcop", ph, x.astype(jnp.float32), pw)
    return y.astype(x.dtype)


def _pick_tb(B, C, N, itemsize):
    """Largest batch-tile whose VMEM working set stays under a cross-chip-safe budget.

    Per batch row we model:
      * 2 inputs x 2 pipeline buffers in the native dtype  -> 4 * itemsize bytes/element
      * ~2 live f32 compute temporaries (upcast / pow)     -> 8 bytes/element
    A ~36 MiB budget leaves headroom under the 48 MiB scoped-VMEM limit we request and is
    safe on v7x (64 MiB physical per TC) as well as v5e/v6e (128 MiB physical).
    """
    budget = 36 * 1024 * 1024
    per_row = max(C * N * (4 * itemsize + 8), 1)
    return int(max(1, min(B, budget // per_row)))


def factor_transfer_loss(f_s, f_t, p1=2, p2=1):
    # Match PyTorch: pool the larger feature map down to the smaller spatial size.
    # TODO(synk): fuse the adaptive pool into the kernel to avoid one extra HBM round
    # trip on the pooled operand when spatial sizes differ.
    s_H, t_H = f_s.shape[2], f_t.shape[2]
    if s_H > t_H:
        f_s = _adaptive_avg_pool_nchw(f_s, t_H)
    elif s_H < t_H:
        f_t = _adaptive_avg_pool_nchw(f_t, s_H)

    B, C, H, W = f_s.shape
    N = H * W
    # Keep native dtypes on the wire (no f32 upcast before the pallas_call).
    fs = f_s.reshape(B, C, N)
    ft = f_t.reshape(B, C, N)

    itemsize = max(jnp.dtype(fs.dtype).itemsize, jnp.dtype(ft.dtype).itemsize)
    tb = _pick_tb(B, C, N, itemsize)
    num_tiles = pl.cdiv(B, tb)
    # TODO(synk): for extremely large C*N where even TB=1 exceeds the VMEM budget, add an
    # inner "arbitrary" C-tile grid axis accumulating sum_over_C(f**p1) in VMEM scratch.

    kernel = functools.partial(_ft_kernel, p1=p1, p2=p2, batch=B, tb=tb)

    bytes_accessed = (
        fs.size * jnp.dtype(fs.dtype).itemsize
        + ft.size * jnp.dtype(ft.dtype).itemsize
        + num_tiles * 8 * 128 * 4
    )
    cost = pl.CostEstimate(
        flops=4 * B * C * N,          # ~2 flop/elem/operand (pow + reduce)
        transcendentals=2 * B,        # per-row sqrt for the L2 norms
        bytes_accessed=bytes_accessed,
    )

    partials = pl.pallas_call(
        kernel,
        out_shape=jax.ShapeDtypeStruct((num_tiles, 8, 128), jnp.float32),
        grid_spec=pltpu.PrefetchScalarGridSpec(
            num_scalar_prefetch=0,
            grid=(num_tiles,),
            in_specs=[
                pl.BlockSpec((tb, C, N), lambda i: (i, 0, 0)),
                pl.BlockSpec((tb, C, N), lambda i: (i, 0, 0)),
            ],
            out_specs=pl.BlockSpec((1, 8, 128), lambda i: (i, 0, 0)),
        ),
        compiler_params=pltpu.CompilerParams(
            dimension_semantics=("parallel",),
            vmem_limit_bytes=48 * 1024 * 1024,
        ),
        cost_estimate=cost,
    )(fs, ft)

    # Tiny epilogue in plain JAX: sum the per-tile partials, divide by B*N (mean).
    return jnp.sum(partials[:, 0, 0]) / (B * N)


def _reference(f_s, f_t, p1=2, p2=1):
    def factor(f):
        B = f.shape[0]
        fac = jnp.mean(f.astype(jnp.float32) ** p1, axis=1).reshape(B, -1)
        nrm = jnp.sqrt(jnp.sum(fac * fac, axis=1, keepdims=True))
        return fac / jnp.maximum(nrm, 1e-12)

    d = factor(f_s) - factor(f_t)
    return jnp.mean(jnp.abs(d)) if p2 == 1 else jnp.mean(d ** p2)


if __name__ == "__main__":
    key = jax.random.PRNGKey(0)
    k1, k2, k3 = jax.random.split(key, 3)

    # Case 1: student and teacher with the same spatial size.
    f_s = jax.random.normal(k1, (2, 4, 16, 16), dtype=jnp.float32)
    f_t = jax.random.normal(k2, (2, 4, 16, 16), dtype=jnp.float32)
    loss = factor_transfer_loss(f_s, f_t, p1=2, p2=1)
    jax.block_until_ready(loss)
    ref = _reference(f_s, f_t, p1=2, p2=1)
    assert jnp.allclose(loss, ref, atol=1e-5, rtol=1e-5), (loss, ref)

    # Case 2: student larger spatially -> adaptive pooling path.
    f_s2 = jax.random.normal(k3, (2, 4, 32, 32), dtype=jnp.float32)
    loss2 = factor_transfer_loss(f_s2, f_t, p1=2, p2=1)
    jax.block_until_ready(loss2)
    ref2 = _reference(_adaptive_avg_pool_nchw(f_s2, 16), f_t, p1=2, p2=1)
    assert jnp.allclose(loss2, ref2, atol=1e-5, rtol=1e-5), (loss2, ref2)

    print("KERNEL_OK")
</pallas_src>

<mosaic_0001>
module attributes {stable_mosaic.version = 11 : i64} {
  func.func @_ft_kernel(%arg0: i32, %arg1: memref<2x4x256xf32, #tpu.memory_space<vmem>>, %arg2: memref<2x4x256xf32, #tpu.memory_space<vmem>>, %arg3: memref<1x8x128xf32, #tpu.memory_space<vmem>>) attributes {dimension_semantics = [#tpu.dimension_semantics<parallel>], iteration_bounds = array<i64: 1>, scalar_prefetch = 0 : i64, scratch_operands = 0 : i64, tpu.core_type = #tpu.core_type<tc>, window_params = [{transform_indices = @transform_0, window_bounds = array<i64: 2, 4, 256>}, {transform_indices = @transform_1, window_bounds = array<i64: 2, 4, 256>}, {transform_indices = @transform_2, window_bounds = array<i64: 1, 8, 128>}]} {
    %c0 = arith.constant 0 : index
    %c0_0 = arith.constant 0 : index
    %c0_1 = arith.constant 0 : index
    %0 = vector.load %arg1[%c0, %c0_0, %c0_1] : memref<2x4x256xf32, #tpu.memory_space<vmem>>, vector<2x4x256xf32>
    %c0_2 = arith.constant 0 : index
    %c0_3 = arith.constant 0 : index
    %c0_4 = arith.constant 0 : index
    %1 = vector.load %arg2[%c0_2, %c0_3, %c0_4] : memref<2x4x256xf32, #tpu.memory_space<vmem>>, vector<2x4x256xf32>
    %2 = arith.mulf %0, %0 : vector<2x4x256xf32>
    %3 = arith.mulf %1, %1 : vector<2x4x256xf32>
    %cst = arith.constant dense<0.000000e+00> : vector<2x256xf32>
    %4 = vector.multi_reduction <add>, %2, %cst [1] : vector<2x4x256xf32> to vector<2x256xf32>
    %cst_5 = arith.constant 2.500000e-01 : f32
    %5 = vector.broadcast %cst_5 : f32 to vector<2x256xf32>
    %6 = arith.mulf %4, %5 : vector<2x256xf32>
    %cst_6 = arith.constant dense<0.000000e+00> : vector<2x256xf32>
    %7 = vector.multi_reduction <add>, %3, %cst_6 [1] : vector<2x4x256xf32> to vector<2x256xf32>
    %cst_7 = arith.constant 2.500000e-01 : f32
    %8 = vector.broadcast %cst_7 : f32 to vector<2x256xf32>
    %9 = arith.mulf %7, %8 : vector<2x256xf32>
    %10 = arith.mulf %6, %6 : vector<2x256xf32>
    %cst_8 = arith.constant dense<0.000000e+00> : vector<2xf32>
    %11 = vector.multi_reduction <add>, %10, %cst_8 [1] : vector<2x256xf32> to vector<2xf32>
    %12 = vector.shape_cast %11 : vector<2xf32> to vector<2x1xf32>
    %13 = math.sqrt %12 : vector<2x1xf32>
    %14 = arith.mulf %9, %9 : vector<2x256xf32>
    %cst_9 = arith.constant dense<0.000000e+00> : vector<2xf32>
    %15 = vector.multi_reduction <add>, %14, %cst_9 [1] : vector<2x256xf32> to vector<2xf32>
    %16 = vector.shape_cast %15 : vector<2xf32> to vector<2x1xf32>
    %17 = math.sqrt %16 : vector<2x1xf32>
    %cst_10 = arith.constant 9.99999996E-13 : f32
    %18 = vector.broadcast %cst_10 : f32 to vector<2x1xf32>
    %19 = arith.maximumf %13, %18 : vector<2x1xf32>
    %20 = vector.broadcast %19 : vector<2x1xf32> to vector<2x256xf32>
    %21 = arith.divf %6, %20 : vector<2x256xf32>
    %cst_11 = arith.constant 9.99999996E-13 : f32
    %22 = vector.broadcast %cst_11 : f32 to vector<2x1xf32>
    %23 = arith.maximumf %17, %22 : vector<2x1xf32>
    %24 = vector.broadcast %23 : vector<2x1xf32> to vector<2x256xf32>
    %25 = arith.divf %9, %24 : vector<2x256xf32>
    %26 = arith.subf %21, %25 : vector<2x256xf32>
    %27 = math.absf %26 : vector<2x256xf32>
    %cst_12 = arith.constant dense<0.000000e+00> : vector<2xf32>
    %28 = vector.multi_reduction <add>, %27, %cst_12 [1] : vector<2x256xf32> to vector<2xf32>
    %29 = vector.shape_cast %28 : vector<2xf32> to vector<2x1xf32>
    %30 = vector.shape_cast %29 : vector<2x1xf32> to vector<1x2x1xf32>
    %cst_13 = arith.constant dense<0.000000e+00> : vector<1xf32>
    %31 = vector.multi_reduction <add>, %30, %cst_13 [1, 2] : vector<1x2x1xf32> to vector<1xf32>
    %32 = vector.shape_cast %31 : vector<1xf32> to vector<1x1x1xf32>
    %33 = vector.extract %32[0, 0, 0] : f32 from vector<1x1x1xf32>
    %34 = vector.broadcast %33 : f32 to vector<1x8x128xf32>
    %c0_14 = arith.constant 0 : index
    %c0_15 = arith.constant 0 : index
    %c0_16 = arith.constant 0 : index
    %35 = vector.load %arg3[%c0_14, %c0_15, %c0_16] : memref<1x8x128xf32, #tpu.memory_space<vmem>>, vector<1x8x128xf32>
    tpu.vector_store %arg3[%c0_14, %c0_15, %c0_16], %34 {strides = array<i32>} : memref<1x8x128xf32, #tpu.memory_space<vmem>>, vector<1x8x128xf32>,
    return
  }
  func.func @transform_0(%arg0: i32) -> (i32, i32, i32) {
    %c0_i32 = arith.constant 0 : i32
    %c0_i32_0 = arith.constant 0 : i32
    %c0_i32_1 = arith.constant 0 : i32
    return %arg0, %c0_i32, %c0_i32_0 : i32, i32, i32
  }
  func.func @transform_1(%arg0: i32) -> (i32, i32, i32) {
    %c0_i32 = arith.constant 0 : i32
    %c0_i32_0 = arith.constant 0 : i32
    %c0_i32_1 = arith.constant 0 : i32
    return %arg0, %c0_i32, %c0_i32_0 : i32, i32, i32
  }
  func.func @transform_2(%arg0: i32) -> (i32, i32, i32) {
    %c0_i32 = arith.constant 0 : i32
    %c0_i32_0 = arith.constant 0 : i32
    %c0_i32_1 = arith.constant 0 : i32
    return %arg0, %c0_i32, %c0_i32_0 : i32, i32, i32
  }
}

</mosaic_0001>

<bundles_post_ra>
// kernel: tpu_custom_call.1
= control target key start
LH: loop header
LB: loop body
LE: loop exit
PB: predicated region body
PF: predicated region fallthrough
CT: control target
= control target key end

     0   :  { %7 = vsyncpa [#allocation3], 0  ;;  %s426_s0 = inlined_call_operand.hbm [shape: f32[2,4,256], index: 0, kind: input, shape index: {}]   ;;  %s427_s1 = inlined_call_operand.hbm [shape: f32[2,4,256], index: 1, kind: input, shape index: {}]   ;;  %s428_s2 = inlined_call_operand.hbm [shape: f32[1,8,128], index: 2, kind: output, shape index: {}]  }
   0x1   :  { %8 = vsyncpa [#allocation6], 0 }
   0x2   :  { %9 = vsyncpa [#allocation4], 0  ;;  %s340_s9 = smov [#allocation2]   ;;  %s268_s13 = scalar_lea.hbm %s426_s0, 256 }
   0x3   :  { %s15_s10 = sshll.u32 %s340_s9, 4  ;;  %p269_p0 = scmp.ne.s32.totalorder %s426_s0, %s268_s13  ;;  %s16_s10 = int_to_ptr.vmem [resolvable:$true] %s15_s10 }
   0x4   :  { %p272_p1 = scmp.lt.u32.totalorder %s268_s13, %s426_s0 }
   0x6   :  { %p274_p2 = pnand %p272_p1, %p269_p0 }
   0x8   :  { %277 = shalt.err (!%p274_p2)
}
   0x9   :  { %s278_s18 = scalar_lea.vmem %s16_s10, 256  ;;  %p283_p4 = scmp.lt.s32.totalorder %s16_s10, %s16_s10 }
   0xa   :  { %p279_p3 = scmp.ne.s32.totalorder %s16_s10, %s278_s18  ;;  %p284_p5 = scmp.lt.s32.totalorder %s278_s18, %s278_s18 }
   0xc   :  { %p285_p6 = por %p284_p5, %p283_p4 }
   0xe   :  { %p286_p7 = pnand %p285_p6, %p279_p3 }
  0x10   :  { %289 = shalt.err (!%p286_p7)
}
  0x11   :  { %s341_s19 = smov 128   ;;  %s342_s20 = smov 8  }
  0x12   :  { %21 = dma.hbm_to_vmem [thread:$0]  %s426_s0, 256, %s16_s10, [#allocation3], %s341_s19, %s341_s19, %s342_s20  }
  0x13   :  { %s343_s23 = smov [#allocation5]   ;;  %s290_s27 = scalar_lea.hbm %s427_s1, 256 }
  0x14   :  { %s27_s24 = sshll.u32 %s343_s23, 4  ;;  %p291_p8 = scmp.ne.s32.totalorder %s427_s1, %s290_s27  ;;  %s28_s24 = int_to_ptr.vmem [resolvable:$true] %s27_s24 }
  0x15   :  { %p294_p9 = scmp.lt.u32.totalorder %s290_s27, %s427_s1 }
  0x17   :  { %p296_p10 = pnand %p294_p9, %p291_p8 }
  0x19   :  { %299 = shalt.err (!%p296_p10)
}
  0x1a   :  { %s300_s4 = scalar_lea.vmem %s28_s24, 256  ;;  %p305_p12 = scmp.lt.s32.totalorder %s28_s24, %s28_s24 }
  0x1b   :  { %p301_p11 = scmp.ne.s32.totalorder %s28_s24, %s300_s4  ;;  %p306_p13 = scmp.lt.s32.totalorder %s300_s4, %s300_s4 }
  0x1d   :  { %p307_p0 = por %p306_p13, %p305_p12 }
  0x1f   :  { %p308_p1 = pnand %p307_p0, %p301_p11 }
  0x21   :  { %311 = shalt.err (!%p308_p1)
}
  0x22   :  { %33 = dma.hbm_to_vmem [thread:$0]  %s427_s1, 256, %s28_s24, [#allocation6], %s341_s19, %s341_s19, %s342_s20  }
  0x23   :  { %334 = dma.done.wait [#allocation3], 256  }
  0x24   :  { %335 = vsyncadd [#allocation3], 4294967040 }
  0x25   :  { %336 = dma.done.wait [#allocation6], 256  }
  0x26   :  { %337 = vsyncadd [#allocation6], 4294967040  ;;  %v40_v0 = vld [vmem:[#allocation2] sm:$0xff]  ;;  %v41_v1 = vld [vmem:[#allocation2 + $0x8] sm:$0xff]  ;;  %vm54_vm0 = vcmask 1043456   ;;  %vm133_vm1 = vcmask 1041409  }
  0x27   :  { %v42_v2 = vld [vmem:[#allocation5] sm:$0xff]  ;;  %v44_v3 = vmul.f32 %v40_v0, %v40_v0  ;;  %v45_v4 = vmul.f32 %v41_v1, %v41_v1  ;;  %v43_v5 = vld [vmem:[#allocation5 + $0x8] sm:$0xff]  ;;  %vm138_vm2 = vcmask 1041408   ;;  %vm220_vm7 = vcmask 1024   ;;  %s344_s1 = smov [#allocation7]  }
  0x28   :  { %v46_v6 = vmul.f32 %v42_v2, %v42_v2  ;;  %v47_v7 = vmul.f32 %v43_v5, %v43_v5  ;;  %s239_s6 = sshll.u32 %s344_s1, 4  ;;  %s240_s6 = int_to_ptr.vmem [resolvable:$true] %s239_s6 }
  0x29   :  { %v50_v8 = vcombine.high %v44_v3, %v44_v3  ;;  %v51_v9 = vcombine.high %v45_v4, %v45_v4  ;;  %v55_v10 = vsel %vm54_vm0, %v44_v3, 0.0  ;;  %v69_v11 = vsel %vm54_vm0, %v45_v4, 0.0  ;;  %s312_s8 = scalar_lea.vmem %s240_s6, 128  ;;  %p317_p3 = scmp.lt.s32.totalorder %s240_s6, %s240_s6 }
  0x2a   :  { %v56_v12 = vrot.slane %v55_v10, 4  ;;  %v70_v13 = vrot.slane %v69_v11, 4  ;;  %v89_v14 = vcombine.high %v46_v6, %v46_v6  ;;  %v90_v15 = vcombine.high %v47_v7, %v47_v7  ;;  %p313_p2 = scmp.ne.s32.totalorder %s240_s6, %s312_s8  ;;  %p318_p4 = scmp.lt.s32.totalorder %s312_s8, %s312_s8 }
  0x2b   :  { %v62_v16 = vsel %vm54_vm0, %v50_v8, 0.0  ;;  %v76_v17 = vsel %vm54_vm0, %v51_v9, 0.0  ;;  %v93_v18 = vsel %vm54_vm0, %v46_v6, 0.0  ;;  %v107_v19 = vsel %vm54_vm0, %v47_v7, 0.0 }
  0x2c   :  { %v57_v20 = vadd.f32 %v56_v12, %v55_v10  ;;  %v63_v21 = vrot.slane %v62_v16, 4  ;;  %v71_v22 = vadd.f32 %v70_v13, %v69_v11  ;;  %v77_v23 = vrot.slane %v76_v17, 4  ;;  %p319_p5 = por %p318_p4, %p317_p3 }
  0x2d   :  { %v94_v24 = vrot.slane %v93_v18, 4  ;;  %v100_v25 = vsel %vm54_vm0, %v89_v14, 0.0  ;;  %v108_v26 = vrot.slane %v107_v19, 4  ;;  %v114_v27 = vsel %vm54_vm0, %v90_v15, 0.0 }
  0x2e   :  { %v58_v28 = vrot.slane %v57_v20, 2  ;;  %v64_v29 = vadd.f32 %v63_v21, %v62_v16  ;;  %v72_v30 = vrot.slane %v71_v22, 2  ;;  %v78_v31 = vadd.f32 %v77_v23, %v76_v17  ;;  %p320_p6 = pnand %p319_p5, %p313_p2 }
  0x2f   :  { %v95_v32 = vadd.f32 %v94_v24, %v93_v18  ;;  %v101_v33 = vrot.slane %v100_v25, 4  ;;  %v109_v34 = vadd.f32 %v108_v26, %v107_v19  ;;  %v115_v35 = vrot.slane %v114_v27, 4 }
  0x30   :  { %v59_v36 = vadd.f32 %v58_v28, %v57_v20  ;;  %v65_v37 = vrot.slane %v64_v29, 2  ;;  %v73_v38 = vadd.f32 %v72_v30, %v71_v22  ;;  %v79_v39 = vrot.slane %v78_v31, 2 }
  0x31   :  { %v96_v40 = vrot.slane %v95_v32, 2  ;;  %v102_v41 = vadd.f32 %v101_v33, %v100_v25  ;;  %v110_v42 = vrot.slane %v109_v34, 2  ;;  %v116_v43 = vadd.f32 %v115_v35, %v114_v27 }
  0x32   :  { %v60_v44 = vrot.slane %v59_v36, 1  ;;  %v66_v45 = vadd.f32 %v65_v37, %v64_v29  ;;  %v74_v46 = vrot.slane %v73_v38, 1  ;;  %v80_v47 = vadd.f32 %v79_v39, %v78_v31 }
  0x33   :  { %v97_v48 = vadd.f32 %v96_v40, %v95_v32  ;;  %v103_v49 = vrot.slane %v102_v41, 2  ;;  %v111_v50 = vadd.f32 %v110_v42, %v109_v34  ;;  %v117_v51 = vrot.slane %v116_v43, 2 }
  0x34   :  { %v61_v52 = vadd.f32 %v60_v44, %v59_v36  ;;  %v67_v53 = vrot.slane %v66_v45, 1  ;;  %v75_v54 = vadd.f32 %v74_v46, %v73_v38  ;;  %v81_v55 = vrot.slane %v80_v47, 1 }
  0x35   :  { %v98_v56 = vrot.slane %v97_v48, 1  ;;  %v104_v57 = vadd.f32 %v103_v49, %v102_v41  ;;  %v112_v58 = vrot.slane %v111_v50, 1  ;;  %v118_v59 = vadd.f32 %v117_v51, %v116_v43 }
  0x36   :  { %v68_v60 = vadd.f32 %v67_v53, %v66_v45  ;;  %v82_v61 = vadd.f32 %v81_v55, %v80_v47  ;;  %v392_v62 = vmul.f32 0.25, %v61_v52  ;;  %v394_v63 = vmul.f32 0.25, %v75_v54 }
  0x37   :  { %v99_v0 = vadd.f32 %v98_v56, %v97_v48  ;;  %v105_v1 = vrot.slane %v104_v57, 1  ;;  %v113_v2 = vadd.f32 %v112_v58, %v111_v50  ;;  %v119_v3 = vrot.slane %v118_v59, 1 }
  0x38   :  { %v84_v4 = vmul.f32 0.25, %v68_v60  ;;  %v86_v5 = vmul.f32 0.25, %v82_v61  ;;  %v125_v6 = vmul.f32 %v392_v62, %v392_v62  ;;  %v127_v7 = vmul.f32 %v394_v63, %v394_v63 }
  0x39   :  { %v106_v8 = vadd.f32 %v105_v1, %v104_v57  ;;  %v120_v9 = vadd.f32 %v119_v3, %v118_v59  ;;  %v121_v10 = vmul.f32 0.25, %v99_v0  ;;  %v123_v11 = vmul.f32 0.25, %v113_v2 }
  0x3a   :  { %v126_v12 = vmul.f32 %v84_v4, %v84_v4  ;;  %v128_v13 = vmul.f32 %v86_v5, %v86_v5  ;;  %v134_v14 = vsel %vm133_vm1, %v127_v7, %v125_v6 }
  0x3b   :  { %v139_v15 = vsel %vm138_vm2, %v134_v14, 0.0  ;;  %v122_v16 = vmul.f32 0.25, %v106_v8  ;;  %v124_v17 = vmul.f32 0.25, %v120_v9  ;;  %v151_v18 = vmul.f32 %v121_v10, %v121_v10 }
  0x3c   :  { %v135_v19 = vsel %vm133_vm1, %v128_v13, %v126_v12  ;;  %v153_v20 = vmul.f32 %v123_v11, %v123_v11 }
  0x3d   :  { %v140_v21 = vsel %vm138_vm2, %v135_v19, 0.0  ;;  %v152_v22 = vmul.f32 %v122_v16, %v122_v16  ;;  %v154_v23 = vmul.f32 %v124_v17, %v124_v17 }
  0x3e   :  { %v141_v24 = vadd.f32 %v140_v21, %v139_v15  ;;  %v159_v25 = vsel %vm133_vm1, %v153_v20, %v151_v18 }
  0x3f   :  { %v160_v26 = vsel %vm133_vm1, %v154_v23, %v152_v22  ;;  %v163_v27 = vsel %vm138_vm2, %v159_v25, 0.0 }
  0x40   :  { %142 = vadd.xlane.f32.xlu0 %v141_v24  ;;  %v164_v28 = vsel %vm138_vm2, %v160_v26, 0.0 }
  0x41   :  { %v165_v29 = vadd.f32 %v164_v28, %v163_v27 }
  0x44   :  { %166 = vadd.xlane.f32.xlu0 %v165_v29 }
  0xcd   :  { %v143_v30 = vpop.xlane.xlu0 %142 }
  0xce   :  { %256 = vrsqrt.f32 %v143_v30  ;;  %vm146_vm3 = vcmp.eq.f32.partialorder %v143_v30, inf  ;;  %v149_v34 = vand.u32 2147483648, %v143_v30  ;;  %vm148_vm4 = vcmp.eq.f32.partialorder %v143_v30, 0.0 }
  0xd1   :  { %v167_v31 = vpop.xlane.xlu0 %166 }
  0xd2   :  { %258 = vrsqrt.f32 %v167_v31  ;;  %vm170_vm5 = vcmp.eq.f32.partialorder %v167_v31, inf  ;;  %v173_v40 = vand.u32 2147483648, %v167_v31  ;;  %vm172_vm6 = vcmp.eq.f32.partialorder %v167_v31, 0.0 }
  0xd8   :  { %v257_v32 = vpop.eup %256 }
  0xd9   :  { %v145_v33 = vmul.f32 %v257_v32, %v143_v30 }
  0xdb   :  { %v147_v35 = vsel %vm146_vm3, %v143_v30, %v145_v33 }
  0xdc   :  { %v259_v36 = vpop.eup %258  ;;  %v150_v37 = vsel %vm148_vm4, %v149_v34, %v147_v35 }
  0xdd   :  { %v175_v38 = vmax.f32 %v150_v37, 1e-12  ;;  %v169_v39 = vmul.f32 %v259_v36, %v167_v31 }
  0xdf   :  { %v177_v41 = vrot.slane %v175_v38, 1  ;;  %v171_v42 = vsel %vm170_vm5, %v167_v31, %v169_v39  ;;  %260 = vrcp.f32 %v175_v38 }
  0xe0   :  { %v174_v43 = vsel %vm172_vm6, %v173_v40, %v171_v42 }
  0xe1   :  { %v186_v44 = vmax.f32 %v174_v43, 1e-12  ;;  %262 = vrcp.f32 %v177_v41 }
  0xe3   :  { %v188_v45 = vrot.slane %v186_v44, 1  ;;  %264 = vrcp.f32 %v186_v44 }
  0xe5   :  { %266 = vrcp.f32 %v188_v45 }
  0xe9   :  { %v261_v46 = vpop.eup %260 }
  0xea   :  { %v181_v52 = vmul.f32 %v261_v46, %v392_v62  ;;  %v182_v53 = vmul.f32 %v261_v46, %v84_v4 }
  0xeb   :  { %v263_v47 = vpop.eup %262 }
  0xec   :  { %v184_v54 = vmul.f32 %v263_v47, %v394_v63  ;;  %v185_v55 = vmul.f32 %v263_v47, %v86_v5 }
  0xed   :  { %v265_v48 = vpop.eup %264 }
  0xee   :  { %v192_v49 = vmul.f32 %v265_v48, %v121_v10  ;;  %v193_v50 = vmul.f32 %v265_v48, %v122_v16 }
  0xef   :  { %v267_v51 = vpop.eup %266 }
  0xf0   :  { %v195_v56 = vmul.f32 %v267_v51, %v123_v11  ;;  %v196_v57 = vmul.f32 %v267_v51, %v124_v17  ;;  %v197_v58 = vsub.f32 %v181_v52, %v192_v49  ;;  %v198_v59 = vsub.f32 %v182_v53, %v193_v50 }
  0xf2   :  { %v199_v60 = vsub.f32 %v184_v54, %v195_v56  ;;  %v200_v61 = vsub.f32 %v185_v55, %v196_v57  ;;  %v201_v2 = vand.u32 2147483647, %v197_v58  ;;  %v202_v3 = vand.u32 2147483647, %v198_v59 }
  0xf4   :  { %v203_v0 = vand.u32 2147483647, %v199_v60  ;;  %v204_v1 = vand.u32 2147483647, %v200_v61 }
  0xf6   :  { %v209_v6 = vrot.slane %v203_v0, 7  ;;  %v211_v7 = vrot.slane %v204_v1, 7 }
  0xf8   :  { %v210_v8 = vsel %vm133_vm1, %v209_v6, %v201_v2  ;;  %v212_v62 = vsel %vm133_vm1, %v211_v7, %v202_v3 }
  0xf9   :  { %v215_v4 = vsel %vm138_vm2, %v210_v8, 0.0  ;;  %v216_v63 = vsel %vm138_vm2, %v212_v62, 0.0 }
  0xfa   :  { %v217_v5 = vadd.f32 %v216_v63, %v215_v4 }
  0xfc   :  { %218 = vadd.xlane.f32.xlu1 %v217_v5 }
 0x189   :  { %v219_v9 = vpop.xlane.xlu1 %218 }
 0x18a   :  { %v221_v10 = vsel %vm220_vm7, %v219_v9, 0.0 }
 0x18b   :  { %222 = vadd.xlane.f32.xlu1 %v221_v10 }
 0x218   :  { %v223_v11 = vpop.xlane.xlu1 %222 }
 0x219   :  { %v224_v12 = vrot.slane %v223_v11, 4 }
 0x21b   :  { %v225_v13 = vadd.f32 %v224_v12, %v223_v11 }
 0x21d   :  { %v226_v14 = vrot.slane %v225_v13, 2 }
 0x21f   :  { %v227_v15 = vadd.f32 %v226_v14, %v225_v13 }
 0x221   :  { %v228_v16 = vrot.slane %v227_v15, 1 }
 0x223   :  { %v229_v17 = vadd.f32 %v228_v16, %v227_v15 }
 0x225   :  { %249 = vpush %v229_v17 }
 0x256   :  { %s250_s7 = spop %249 }
 0x257   :  { %v231_v18 = vstv %s250_s7 }
 0x258   :  { %232 = vst [vmem:[#allocation7] sm:$0xff] %v231_v18 }
 0x259   :  { %323 = shalt.err (!%p320_p6)
}
 0x25a   :  { %s324_s11 = scalar_lea.hbm %s428_s2, 128 }
 0x25b   :  { %p325_p7 = scmp.ne.s32.totalorder %s428_s2, %s324_s11  ;;  %p328_p8 = scmp.lt.u32.totalorder %s324_s11, %s428_s2 }
 0x25d   :  { %p330_p9 = pnand %p328_p8, %p325_p7 }
 0x25f   :  { %333 = shalt.err (!%p330_p9)
}
 0x260   :  { %242 = dma.vmem_to_hbm [thread:$0]  %s240_s6, 128, %s428_s2, [#allocation4]  }
 0x261   :  { %338 = dma.done.wait [#allocation4], 128  }
 0x262   :  { %339 = vsyncadd [#allocation4], 4294967168 }
 0x263   :  { %246 = vsyncpa [#allocation3], 1 }
 0x264   :  { %247 = vsyncpa [#allocation6], 1 }
 0x265   :  { %248 = vsyncpa [#allocation4], 1 }

</bundles_post_ra>
